<compile_context>
chip_gen: v7x
topology: tpu7x:2x2x1
jax: 0.10.0
libtpu: 0.0.40
codegen_flags: <defaults>
</compile_context>

<pallas_src>
import functools

import jax
import jax.numpy as jnp
from jax.experimental import pallas as pl
from jax.experimental.pallas import tpu as pltpu

_LANE = 128
# Below this many (128-aligned) elements the whole BCE is done in plain JAX.
# Kept small so the demo shapes go through the Pallas path; production could
# raise this to ~256K elements per the perf review.
_MIN_PALLAS_ELEMS = 1024


def _bce_partial_kernel(recons_ref, input_ref, out_ref, *,
                        valid_rows, block_rows, needs_mask):
    """Per-tile BCE partial sum, reduced to one (8,128) vreg (VPU-only adds)."""
    x = recons_ref[...].astype(jnp.float32)
    y = input_ref[...].astype(jnp.float32)

    if needs_mask:
        # Last grid step covers rows past the end of the array; those reads
        # are unspecified, so force them to (x=1, y=1) which contributes
        # exactly 0 to the BCE sum (thanks to the -100 clamp ordering below).
        row0 = pl.program_id(0) * block_rows
        rid = jax.lax.broadcasted_iota(jnp.int32, x.shape, 0) + row0
        in_bounds = rid < valid_rows
        one = jnp.float32(1.0)
        x = jnp.where(in_bounds, x, one)
        y = jnp.where(in_bounds, y, one)

    # PyTorch F.binary_cross_entropy clamps each log term at -100 (clamp is
    # applied BEFORE the (1-y) multiply, so x==1/y==1 padding is exactly 0).
    log_x = jnp.maximum(jnp.log(x), -100.0)
    log_1mx = jnp.maximum(jnp.log1p(-x), -100.0)
    bce = -(y * log_x + (1.0 - y) * log_1mx)

    r, c = bce.shape
    # (r,128) -> (r//8, 8, 128) is a vreg-tile-aligned view; the sum over
    # axis 0 is a tree of vreg-wide VPU adds — no per-step XLU/scalar work.
    partial = jnp.sum(bce.reshape(r // 8, 8, c), axis=0)
    out_ref[...] = partial[None, :, :]


def _bce_sum_pallas(r2, i2, tile_rows):
    """Total BCE sum over a (rows, 128) slab via a grid of partial-sum tiles."""
    rows = r2.shape[0]

    # Pick the tile: multiple of 8 sublanes, capped at `tile_rows`, and small
    # enough that there are >= ~8 grid steps (keeps both v7x TCs fed via the
    # "parallel" axis) whenever the input is big enough to matter.
    min_tiles = 8
    split_cap = ((pl.cdiv(rows, min_tiles) + 7) // 8) * 8
    eff_tile_rows = max(8, min((int(tile_rows) // 8) * 8, split_cap))
    num_tiles = pl.cdiv(rows, eff_tile_rows)
    needs_mask = (rows % eff_tile_rows) != 0

    itemsize_r = jnp.dtype(r2.dtype).itemsize
    itemsize_i = jnp.dtype(i2.dtype).itemsize
    bytes_per_step = eff_tile_rows * _LANE * (itemsize_r + itemsize_i)
    # 2x for double-buffering, plus headroom; stay under v7x's 64 MiB physical.
    vmem_limit = int(min(max(32 << 20, 2 * bytes_per_step + (4 << 20)), 48 << 20))

    n_elems = rows * _LANE
    cost = pl.CostEstimate(
        flops=8 * n_elems,
        transcendentals=2 * n_elems,
        bytes_accessed=n_elems * (itemsize_r + itemsize_i)
        + num_tiles * 8 * _LANE * 4,
    )

    kernel = functools.partial(
        _bce_partial_kernel,
        valid_rows=rows,
        block_rows=eff_tile_rows,
        needs_mask=needs_mask,
    )

    partials = pl.pallas_call(
        kernel,
        out_shape=jax.ShapeDtypeStruct((num_tiles, 8, _LANE), jnp.float32),
        grid_spec=pltpu.PrefetchScalarGridSpec(
            num_scalar_prefetch=0,
            grid=(num_tiles,),
            in_specs=[
                pl.BlockSpec((eff_tile_rows, _LANE), lambda i: (i, 0)),
                pl.BlockSpec((eff_tile_rows, _LANE), lambda i: (i, 0)),
            ],
            out_specs=pl.BlockSpec((1, 8, _LANE), lambda i: (i, 0, 0)),
        ),
        compiler_params=pltpu.CompilerParams(
            # Each grid step writes an independent output block -> parallel;
            # on v7x both TensorCores share the reduction.
            dimension_semantics=("parallel",),
            vmem_limit_bytes=vmem_limit,
        ),
        cost_estimate=cost,
    )(r2, i2)

    return jnp.sum(partials, dtype=jnp.float32)


def _bce_sum_ref(x, y):
    """Plain-JAX BCE sum (small tails / tiny inputs)."""
    x = x.astype(jnp.float32)
    y = y.astype(jnp.float32)
    log_x = jnp.maximum(jnp.log(x), -100.0)
    log_1mx = jnp.maximum(jnp.log1p(-x), -100.0)
    return jnp.sum(-(y * log_x + (1.0 - y) * log_1mx))


def vae_loss(recons, input_, mu, log_var, kld_weight=0.005, tile_rows=4096):
    """Pallas implementation of VAELoss.forward."""
    n_total = recons.size
    flat_r = recons.reshape(-1)
    flat_i = input_.reshape(-1)

    n128 = (n_total // _LANE) * _LANE

    if n128 >= _MIN_PALLAS_ELEMS:
        rows = n128 // _LANE
        if n128 == n_total:
            # Common case: pure (free) reshape, no extra HBM traffic.
            main_r = flat_r.reshape(rows, _LANE)
            main_i = flat_i.reshape(rows, _LANE)
            tail_sum = jnp.float32(0.0)
        else:
            # Rare case (element count not a multiple of 128): the prefix
            # slice costs one extra copy of the bulk; the <128-element tail
            # is summed in plain JAX.
            main_r = flat_r[:n128].reshape(rows, _LANE)
            main_i = flat_i[:n128].reshape(rows, _LANE)
            tail_sum = _bce_sum_ref(flat_r[n128:], flat_i[n128:])
        bce_sum = _bce_sum_pallas(main_r, main_i, tile_rows) + tail_sum
    else:
        # Tiny problem: kernel-launch + separate reduction overhead dominates.
        bce_sum = _bce_sum_ref(flat_r, flat_i)

    recons_loss = bce_sum / jnp.float32(n_total)

    # KL term touches only B*D elements: plain JAX.
    mu32 = mu.astype(jnp.float32)
    lv32 = log_var.astype(jnp.float32)
    kld_loss = jnp.mean(
        -0.5 * jnp.sum(1.0 + lv32 - mu32 * mu32 - jnp.exp(lv32), axis=1))

    loss = recons_loss + jnp.float32(kld_weight) * kld_loss
    # Matches the PyTorch return dict exactly (kld_loss key holds -kld).
    return {"loss": loss, "reconstruct": recons_loss, "kld_loss": -kld_loss}


def _reference(recons, input_, mu, log_var, kld_weight=0.005):
    x = recons.astype(jnp.float32)
    y = input_.astype(jnp.float32)
    log_x = jnp.maximum(jnp.log(x), -100.0)
    log_1mx = jnp.maximum(jnp.log1p(-x), -100.0)
    recons_loss = jnp.mean(-(y * log_x + (1.0 - y) * log_1mx))
    mu32 = mu.astype(jnp.float32)
    lv32 = log_var.astype(jnp.float32)
    kld_loss = jnp.mean(
        -0.5 * jnp.sum(1.0 + lv32 - mu32 * mu32 - jnp.exp(lv32), axis=1))
    loss = recons_loss + kld_weight * kld_loss
    return {"loss": loss, "reconstruct": recons_loss, "kld_loss": -kld_loss}


def _run_case(key, shape, dtype, latent_dim=32, kld_weight=0.005):
    k1, k2, k3, k4 = jax.random.split(key, 4)
    B = shape[0]
    recons = jax.nn.sigmoid(jax.random.normal(k1, shape, jnp.float32)).astype(dtype)
    target = jax.random.uniform(k2, shape, jnp.float32).astype(dtype)
    mu = 0.1 * jax.random.normal(k3, (B, latent_dim), jnp.float32)
    log_var = 0.1 * jax.random.normal(k4, (B, latent_dim), jnp.float32)

    out = vae_loss(recons, target, mu, log_var, kld_weight=kld_weight)
    out = jax.tree_util.tree_map(jax.block_until_ready, out)
    ref = _reference(recons, target, mu, log_var, kld_weight=kld_weight)
    for name in ("loss", "reconstruct", "kld_loss"):
        assert jnp.allclose(out[name], ref[name], rtol=1e-4, atol=1e-5), (
            shape, dtype, name, out[name], ref[name])


if __name__ == "__main__":
    key = jax.random.PRNGKey(0)
    keys = jax.random.split(key, 4)

    # Primary small shape (NCHW): 2048 elems, multiple of 128 -> zero-copy path.
    _run_case(keys[0], (2, 4, 16, 16), jnp.float32)
    # Element count multiple of 128 but not of the tile -> in-kernel row mask.
    _run_case(keys[1], (2, 3, 40, 24), jnp.float32)
    # Element count NOT a multiple of 128 -> bulk kernel + plain-JAX tail.
    _run_case(keys[2], (2, 3, 37, 53), jnp.float32)
    # bf16 inputs: original-dtype DMA, f32 math in-register.
    _run_case(keys[3], (2, 4, 16, 16), jnp.bfloat16)

    print("KERNEL_OK")
</pallas_src>

<mosaic_0001>
module attributes {stable_mosaic.version = 11 : i64} {
  func.func @_bce_partial_kernel(%arg0: i32, %arg1: memref<8x128xf32, #tpu.memory_space<vmem>>, %arg2: memref<8x128xf32, #tpu.memory_space<vmem>>, %arg3: memref<1x8x128xf32, #tpu.memory_space<vmem>>) attributes {dimension_semantics = [#tpu.dimension_semantics<parallel>], iteration_bounds = array<i64: 2>, scalar_prefetch = 0 : i64, scratch_operands = 0 : i64, tpu.core_type = #tpu.core_type<tc>, window_params = [{transform_indices = @transform_0, window_bounds = array<i64: 8, 128>}, {transform_indices = @transform_1, window_bounds = array<i64: 8, 128>}, {transform_indices = @transform_2, window_bounds = array<i64: 1, 8, 128>}]} {
    %c0 = arith.constant 0 : index
    %c0_0 = arith.constant 0 : index
    %0 = vector.load %arg1[%c0, %c0_0] : memref<8x128xf32, #tpu.memory_space<vmem>>, vector<8x128xf32>
    %c0_1 = arith.constant 0 : index
    %c0_2 = arith.constant 0 : index
    %1 = vector.load %arg2[%c0_1, %c0_2] : memref<8x128xf32, #tpu.memory_space<vmem>>, vector<8x128xf32>
    %2 = math.log %0 : vector<8x128xf32>
    %cst = arith.constant -1.000000e+02 : f32
    %3 = vector.broadcast %cst : f32 to vector<8x128xf32>
    %4 = arith.maximumf %2, %3 : vector<8x128xf32>
    %cst_3 = arith.constant 0.000000e+00 : f32
    %5 = vector.broadcast %cst_3 : f32 to vector<8x128xf32>
    %6 = arith.subf %5, %0 : vector<8x128xf32>
    %7 = math.log1p %6 : vector<8x128xf32>
    %cst_4 = arith.constant -1.000000e+02 : f32
    %8 = vector.broadcast %cst_4 : f32 to vector<8x128xf32>
    %9 = arith.maximumf %7, %8 : vector<8x128xf32>
    %10 = arith.mulf %1, %4 : vector<8x128xf32>
    %cst_5 = arith.constant 1.000000e+00 : f32
    %11 = vector.broadcast %cst_5 : f32 to vector<8x128xf32>
    %12 = arith.subf %11, %1 : vector<8x128xf32>
    %13 = arith.mulf %12, %9 : vector<8x128xf32>
    %14 = arith.addf %10, %13 : vector<8x128xf32>
    %cst_6 = arith.constant 0.000000e+00 : f32
    %15 = vector.broadcast %cst_6 : f32 to vector<8x128xf32>
    %16 = arith.subf %15, %14 : vector<8x128xf32>
    %17 = vector.shape_cast %16 : vector<8x128xf32> to vector<1x8x128xf32>
    %cst_7 = arith.constant dense<0.000000e+00> : vector<8x128xf32>
    %18 = vector.multi_reduction <add>, %17, %cst_7 [0] : vector<1x8x128xf32> to vector<8x128xf32>
    %19 = vector.shape_cast %18 : vector<8x128xf32> to vector<1x8x128xf32>
    %c0_8 = arith.constant 0 : index
    %c0_9 = arith.constant 0 : index
    %c0_10 = arith.constant 0 : index
    %20 = vector.load %arg3[%c0_8, %c0_9, %c0_10] : memref<1x8x128xf32, #tpu.memory_space<vmem>>, vector<1x8x128xf32>
    tpu.vector_store %arg3[%c0_8, %c0_9, %c0_10], %19 {strides = array<i32>} : memref<1x8x128xf32, #tpu.memory_space<vmem>>, vector<1x8x128xf32>,
    return
  }
  func.func @transform_0(%arg0: i32) -> (i32, i32) {
    %c0_i32 = arith.constant 0 : i32
    %c0_i32_0 = arith.constant 0 : i32
    return %arg0, %c0_i32 : i32, i32
  }
  func.func @transform_1(%arg0: i32) -> (i32, i32) {
    %c0_i32 = arith.constant 0 : i32
    %c0_i32_0 = arith.constant 0 : i32
    return %arg0, %c0_i32 : i32, i32
  }
  func.func @transform_2(%arg0: i32) -> (i32, i32, i32) {
    %c0_i32 = arith.constant 0 : i32
    %c0_i32_0 = arith.constant 0 : i32
    %c0_i32_1 = arith.constant 0 : i32
    return %arg0, %c0_i32, %c0_i32_0 : i32, i32, i32
  }
}

</mosaic_0001>

<bundles_post_ra>
// kernel: tpu_custom_call.1
= control target key start
LH: loop header
LB: loop body
LE: loop exit
PB: predicated region body
PF: predicated region fallthrough
CT: control target
= control target key end

     0   :  { %7 = vsyncpa [#allocation3], 0  ;;  %s760_s0 = inlined_call_operand.hbm [shape: f32[16,128], index: 0, kind: input, shape index: {}]   ;;  %s761_s1 = inlined_call_operand.hbm [shape: f32[16,128], index: 1, kind: input, shape index: {}]   ;;  %s762_s2 = inlined_call_operand.hbm [shape: f32[2,8,128], index: 2, kind: output, shape index: {}]  }
   0x1   :  { %9 = vsyncpa [#allocation3 + $0x1], 0 }
   0x2   :  { %10 = vsyncpa [#allocation6], 0 }
   0x3   :  { %12 = vsyncpa [#allocation6 + $0x1], 0 }
   0x4   :  { %13 = vsyncpa [#allocation4], 0 }
   0x5   :  { %15 = vsyncpa [#allocation4 + $0x1], 0  ;;  %s546_s9 = smov 0   ;;  %s548_s10 = smov 0  }
   0x6   :  { %s550_s11 = smov 0   ;;  %s552_s12 = smov 0  }
   0x7 LB: > { %s567_s13 = sadd.s32 4294967295, %s526_s12   ;;  %s326_s14 = sadd.s32 4294967294, %s526_s12   ;;  %s526_s12 = sphi %s552_s12, %s781_s12   ;;  %s522_s11 = sphi %s550_s11, %s780_s11   ;;  %s518_s10 = sphi %s548_s10, %s779_s10   ;;  %s514_s9 = sphi %s546_s9, %s778_s9  }
   0x8   : > { %s571_s15 = sadd.s32 1, %s526_s12   ;;  %s28_s16 = sadd.s32 1, %s522_s11 }
   0x9   : > { %s25_s17 = ssub.s32 %s526_s12, %s571_s15  ;;  %p35_p0 = scmp.ne.s32.totalorder %s522_s11, %s518_s10 }
   0xa   : > { %p26_p1 = scmp.eq.s32.totalorder %s25_s17, 0  ;;  %p36_p2 = scmp.eq.s32.totalorder %s526_s12, 0 }
   0xb   : > { %p41_p3 = scmp.ne.s32.totalorder %s518_s10, %s514_s9  ;;  %p42_p4 = scmp.eq.s32.totalorder %s567_s13, 0 }
   0xc   : > { %s583_s18 = scalar_select %p26_p1, %s522_s11, %s28_s16  }
   0xd   : > { %p585_p5 = por %p36_p2, %p35_p0  ;;  %p589_p6 = por %p42_p4, %p41_p3 }
   0xe   : > { %p91_p7 = scmp.eq.s32.totalorder %s567_s13, 1  ;;  %p97_p8 = scmp.eq.s32.totalorder %s326_s14, 1 }
   0xf   : > { %s766_s20 = scalar_select %p589_p6, 1, 0 }
  0x10   : > { %p358_p10 = scmp.lt.s32.totalorder %s526_s12, 2  ;;  %p596_p11 = por %p91_p7, %p35_p0 }
  0x11   : > { %p600_p12 = por %p97_p8, %p41_p3  ;;  %s605_s23 = sand.u32 1, %s522_s11  }
  0x12   : > { %s767_s21 = scalar_select %p596_p11, 1, 0 }
  0x13   : > { %s768_s22 = scalar_select %p600_p12, 1, 0 }
  0x14   : > { %s330_s24 = sshll.u32 %s526_s12, 7  ;;  %s329_s25 = sshll.u32 %s605_s23, 3 }
  0x15   : > { %s614_s28 = scalar_lea.hbm %s760_s0, %s330_s24  ;;  %s121_s29 = scalar_lea.vmem [#allocation2], %s329_s25 }
  0x16   : > { %s128_s30 = sshll.u32 %s121_s29, 4  ;;  %p620_p13 = pnand %p358_p10, %p585_p5  ;;  %s624_s30 = int_to_ptr.vmem [resolvable:$true] %s128_s30 }
  0x17   : > { %s118_s4 = scalar_lea.sflag [#allocation3], %s605_s23  ;;  %s396_s5 = scalar_lea.hbm %s614_s28, 128 }
  0x18   : > { %p397_p2 = scmp.ne.s32.totalorder %s614_s28, %s396_s5  ;;  %p398_p3 = pneg %p620_p13 }
  0x19   : > { %s401_s8 = scalar_lea.hbm %s760_s0, 256  ;;  %p402_p5 = scmp.lt.u32.totalorder %s614_s28, %s760_s0 }
  0x1a   : > { %p399_p4 = pnand %p398_p3, %p397_p2  ;;  %p403_p8 = scmp.lt.u32.totalorder %s401_s8, %s396_s5 }
  0x1b   : > { %p405_p9 = scmp.lt.u32.totalorder %s396_s5, %s614_s28 }
  0x1c   : > { %p400_p7 = pneg %p399_p4  ;;  %p404_p10 = por %p403_p8, %p402_p5 }
  0x1e   : > { %p406_p0 = por %p405_p9, %p404_p10 }
  0x20   : > { %p407_p1 = pnand %p406_p0, %p400_p7 }
  0x22   : > { %410 = shalt.err (!%p407_p1)
}
  0x23   : > { %s411_s17 = scalar_lea.vmem %s624_s30, 128  ;;  %s528_s19 = smov [#allocation2]  }
  0x24   : > { %p412_p2 = scmp.ne.s32.totalorder %s624_s30, %s411_s17  ;;  %s416_s26 = sshll.u32 %s528_s19, 4  ;;  %s417_s26 = int_to_ptr.vmem [resolvable:$false] %s416_s26 }
  0x25   : > { %s418_s27 = scalar_lea.vmem %s417_s26, 256  ;;  %p419_p11 = scmp.lt.s32.totalorder %s624_s30, %s417_s26 }
  0x26   : > { %p414_p4 = pnand %p412_p2, %p398_p3  ;;  %p420_p5 = scmp.lt.s32.totalorder %s418_s27, %s411_s17 }
  0x28   : > { %p415_p12 = pneg %p414_p4  ;;  %p421_p8 = por %p420_p5, %p419_p11 }
  0x2a   : > { %p422_p9 = pnand %p421_p8, %p415_p12 }
  0x2c   : > { %425 = shalt.err (!%p422_p9)
}
  0x2d   : > { %350 = dma.hbm_to_vmem [thread:$0]  (!%p620_p13), %s614_s28, 128, %s624_s30, %s118_s4  }
  0x2e   : > { %p770_p0 = scmp.lt.s32.totalorder %s526_s12, 3  ;;  %p771_p1 = scmp.ge.s32.totalorder %s526_s12, 1 }
  0x2f   : > { %s667_s7 = scalar_lea.hbm %s761_s1, %s330_s24  ;;  %s139_s8 = scalar_lea.vmem [#allocation5], %s329_s25 }
  0x30   : > { %p658_p7 = pnand %p771_p1, %p770_p0  ;;  %s146_s14 = sshll.u32 %s139_s8, 4  ;;  %s147_s14 = int_to_ptr.vmem [resolvable:$true] %s146_s14 }
  0x31   : > { %s136_s28 = scalar_lea.sflag [#allocation6], %s605_s23  ;;  %s426_s30 = scalar_lea.hbm %s667_s7, 128 }
  0x32   : > { %s772_s29 = scalar_select %p658_p7, 1, 0 }
  0x33   : > { %p427_p11 = scmp.ne.s32.totalorder %s667_s7, %s426_s30  ;;  %s431_s24 = scalar_lea.hbm %s761_s1, 256 }
  0x34   : > { %p432_p2 = scmp.lt.u32.totalorder %s667_s7, %s761_s1  ;;  %p433_p4 = scmp.lt.u32.totalorder %s431_s24, %s426_s30 }
  0x35   : > { %p429_p12 = pnand %p427_p11, %p398_p3  ;;  %p435_p8 = scmp.lt.u32.totalorder %s426_s30, %s667_s7 }
  0x36   : > { %p434_p5 = por %p433_p4, %p432_p2 }
  0x37   : > { %p430_p10 = pneg %p429_p12 }
  0x38   : > { %p436_p9 = por %p435_p8, %p434_p5 }
  0x3a   : > { %p437_p0 = pnand %p436_p9, %p430_p10 }
  0x3c   : > { %440 = shalt.err (!%p437_p0)
}
  0x3d   : > { %s441_s23 = scalar_lea.vmem %s147_s14, 128  ;;  %s529_s25 = smov [#allocation5]  }
  0x3e   : > { %p442_p1 = scmp.ne.s32.totalorder %s147_s14, %s441_s23  ;;  %s446_s26 = sshll.u32 %s529_s25, 4  ;;  %s447_s26 = int_to_ptr.vmem [resolvable:$false] %s446_s26 }
  0x3f   : > { %s448_s27 = scalar_lea.vmem %s447_s26, 256  ;;  %p449_p6 = scmp.lt.s32.totalorder %s147_s14, %s447_s26 }
  0x40   : > { %p444_p11 = pnand %p442_p1, %p398_p3  ;;  %p450_p7 = scmp.lt.s32.totalorder %s448_s27, %s441_s23 }
  0x42   : > { %p445_p12 = pneg %p444_p11  ;;  %p451_p2 = por %p450_p7, %p449_p6 }
  0x44   : > { %p452_p4 = pnand %p451_p2, %p445_p12 }
  0x46   : > { %455 = shalt.err (!%p452_p4)
}
  0x47   : > { %353 = dma.hbm_to_vmem [thread:$0]  (!%p620_p13), %s667_s7, 128, %s147_s14, %s136_s28  }
  0x48   : > { %p773_p10 = scmp.ne.s32.totalorder %s772_s29, 0 }
  0x49   : > { %s694_s5 = sand.u32 (!%p773_p10), 1, %s518_s10   ;;  %p774_p6 = scmp.ne.s32.totalorder (!%p773_p10), %s766_s20, 0 }
  0x4a   : > { %155 = sbr.rel (%p773_p10) target bundleno = 125 (0x7d), region = 28  ;;  %s697_s6 = sshll.u32 (!%p773_p10), %s694_s5, 3 }
  0x4b   : > { %s158_s8 = scalar_lea.sflag (!%p773_p10), [#allocation3], %s694_s5  ;;  %s161_s30 = scalar_lea.vmem (!%p773_p10), [#allocation2], %s697_s6 }
  0x51   : > { %501 = dma.done.wait (%p774_p6), %s158_s8, 128  }
  0x52   : > { %503 = vsyncadd (%p774_p6), %s158_s8, 4294967168  ;;  %s167_s3 = scalar_lea.sflag [#allocation6], %s694_s5  ;;  %s170_s29 = scalar_lea.vmem [#allocation5], %s697_s6 }
  0x53   : > { %505 = dma.done.wait (%p774_p6), %s167_s3, 128  }
  0x54   : > { %507 = vsyncadd (%p774_p6), %s167_s3, 4294967168  ;;  %v196_v0 = vld [vmem:[%s161_s30] sm:$0xff]  ;;  %v197_v8 = vld [vmem:[%s170_s29] sm:$0xff]  ;;  %s195_s20 = scalar_lea.vmem [#allocation7], %s697_s6  ;;  %s338_s14 = sshll.u32 %s567_s13, 7 }
  0x55   : > { %392 = vlog2.f32 %v196_v0  ;;  %v201_v1 = vsub.f32 0.0, %v196_v0  ;;  %v213_v13 = vsub.f32 1.0, %v197_v8  ;;  %s233_s7 = sshll.u32 %s195_s20, 4  ;;  %s718_s16 = scalar_lea.hbm %s762_s2, %s338_s14  ;;  %s713_s7 = int_to_ptr.vmem [resolvable:$true] %s233_s7 }
  0x56   : > { %s220_s24 = scalar_lea.sflag [#allocation4], %s694_s5  ;;  %s456_s17 = scalar_lea.vmem %s713_s7, 128 }
  0x57   : > { %v202_v2 = vadd.f32 1.0, %v201_v1  ;;  %v205_v3 = vmul.f32 -0.5, %v201_v1  ;;  %v208_v6 = vand.u32 2147483647, %v201_v1  ;;  %p457_p13 = scmp.ne.s32.totalorder %s713_s7, %s456_s17  ;;  %p775_p3 = scmp.ne.s32.totalorder %s767_s21, 0 }
  0x58   : > { %s530_s13 = smov [#allocation7]  }
  0x59   : > { %394 = vlog2.f32 %v202_v2  ;;  %v206_v4 = vadd.f32 1.0, %v205_v3  ;;  %vm209_vm0 = vcmp.lt.f32.partialorder %v208_v6, 0.0004427343  ;;  %p458_p7 = pnand %p457_p13, %p775_p3  ;;  %s460_s19 = sshll.u32 %s530_s13, 4  ;;  %s461_s19 = int_to_ptr.vmem [resolvable:$false] %s460_s19 }
  0x5a   : > { %s462_s23 = scalar_lea.vmem %s461_s19, 256  ;;  %p463_p8 = scmp.lt.s32.totalorder %s713_s7, %s461_s19 }
  0x5b   : > { %v207_v9 = vmul.f32 %v206_v4, %v201_v1  ;;  %p459_p5 = pneg %p458_p7  ;;  %p464_p9 = scmp.lt.s32.totalorder %s462_s23, %s456_s17 }
  0x5d   : > { %p465_p0 = por %p464_p9, %p463_p8 }
  0x5f   : > { %v393_v5 = vpop.eup %392  ;;  %p466_p1 = pnand %p465_p0, %p459_p5 }
  0x60   : > { %v199_v7 = vmul.f32 0.6931472, %v393_v5 }
  0x62   : > { %v200_v11 = vmax.f32 %v199_v7, -100.0 }
  0x63   : > { %v395_v10 = vpop.eup %394 }
  0x64   : > { %v204_v12 = vmul.f32 0.6931472, %v395_v10  ;;  %v212_v16 = vmul.f32 %v200_v11, %v197_v8 }
  0x66   : > { %v210_v14 = vsel %vm209_vm0, %v207_v9, %v204_v12 }
  0x67   : > { %v211_v15 = vmax.f32 %v210_v14, -100.0 }
  0x69   : > { %v214_v17 = vmul.f32 %v213_v13, %v211_v15 }
  0x6b   : > { %v215_v18 = vadd.f32 %v214_v17, %v212_v16 }
  0x6d   : > { %v216_v19 = vsub.f32 0.0, %v215_v18 }
  0x6f   : > { %218 = vst [vmem:[%s195_s20] sm:$0xff] %v216_v19 }
  0x70   : > { %469 = shalt.err (!%p466_p1)
}
  0x71   : > { %s470_s25 = scalar_lea.hbm %s718_s16, 128  ;;  %s474_s5 = scalar_lea.hbm %s762_s2, 256 }
  0x72   : > { %p471_p11 = scmp.ne.s32.totalorder %s718_s16, %s470_s25  ;;  %p475_p4 = scmp.lt.u32.totalorder %s718_s16, %s762_s2 }
  0x73   : > { %p476_p10 = scmp.lt.u32.totalorder %s474_s5, %s470_s25  ;;  %p478_p13 = scmp.lt.u32.totalorder %s470_s25, %s718_s16 }
  0x74   : > { %p472_p12 = pnand %p471_p11, %p775_p3 }
  0x75   : > { %p477_p6 = por %p476_p10, %p475_p4 }
  0x76   : > { %p473_p2 = pneg %p472_p12 }
  0x77   : > { %p479_p7 = por %p478_p13, %p477_p6 }
  0x79   : > { %p480_p5 = pnand %p479_p7, %p473_p2 }
  0x7b   : > { %483 = shalt.err (!%p480_p5)
}
  0x7c   : > { %345 = dma.vmem_to_hbm [thread:$0]  (%p775_p3), %s713_s7, 128, %s718_s16, %s220_s24  }
  0x7d PF: > { %s245_s30 = sand.u32 1, %s514_s9   ;;  %p776_p8 = scmp.ne.s32.totalorder %s768_s22, 0 }
  0x7e   : > { %p777_p9 = scmp.ge.s32.totalorder %s526_s12, 2  ;;  %s246_s3 = scalar_lea.sflag [#allocation4], %s245_s30 }
  0x80   : > { %p355_p0 = pnand %p777_p9, %p776_p8 }
  0x82   : > { %509 = dma.done.wait (!%p355_p0), %s246_s3, 128  }
  0x83   : > { %511 = vsyncadd (!%p355_p0), %s246_s3, 4294967168  ;;  %p18_p1 = scmp.ge.s32.totalorder %s571_s15, 4   ;;  %s778_s9 = smov %s518_s10 }
  0x84   : > { %s779_s10 = smov %s522_s11  ;;  %s780_s11 = smov %s583_s18 }
  0x85   : > { %s781_s12 = smov %s571_s15  ;;  %20 = sbr.rel (!%p18_p1) target bundleno = 7 (0x7), region = 86 }
  0x8c   :  { %251 = vsyncpa [#allocation3], 1 }
  0x8d   :  { %253 = vsyncpa [#allocation3 + $0x1], 1 }
  0x8e   :  { %254 = vsyncpa [#allocation6], 1 }
  0x8f   :  { %256 = vsyncpa [#allocation6 + $0x1], 1 }
  0x90   :  { %257 = vsyncpa [#allocation4], 1 }
  0x91   :  { %259 = vsyncpa [#allocation4 + $0x1], 1 }

</bundles_post_ra>
